<compile_context>
chip_gen: v5e
topology: v5e:2x2
jax: 0.10.0
libtpu: 0.0.40
codegen_flags: <defaults>
</compile_context>

<pallas_src>
import jax
import jax.numpy as jnp
import numpy as np
from jax.experimental import pallas as pl
from jax.experimental.pallas import tpu as pltpu


def _round_up(x, m):
    return ((x + m - 1) // m) * m


# ---------------------------------------------------------------------------
# Kernel 1: weight-resident path.
# Grid is 1-D over M; w_ref (K, Np) and b_ref (1, Np) use constant index_maps
# so they are fetched once and stay in VMEM across all M blocks.
# ---------------------------------------------------------------------------
def _resident_kernel(x_ref, w_ref, b_ref, o_ref):
    o_ref[...] = (jnp.dot(x_ref[...], w_ref[...],
                          preferred_element_type=jnp.float32)
                  + b_ref[...]).astype(o_ref.dtype)


# ---------------------------------------------------------------------------
# Kernel 2a: streamed fallback, f32 output.  The output block is resident
# across the K axis, so accumulate directly into it (no scratch); bias added
# in the finalize branch.  Weight tiles arrive as contiguous (1, tk, tn) slabs.
# ---------------------------------------------------------------------------
def _streamed_kernel_f32(x_ref, w_ref, b_ref, o_ref):
    k = pl.program_id(2)

    @pl.when(k == 0)
    def _():
        o_ref[...] = jnp.zeros_like(o_ref)

    o_ref[...] += jnp.dot(x_ref[...], w_ref[0],
                          preferred_element_type=jnp.float32)

    @pl.when(k == pl.num_programs(2) - 1)
    def _():
        o_ref[...] += b_ref[...]


# Kernel 2b: streamed fallback, non-f32 output -> keep an f32 VMEM accumulator
# and cast once at the end.
def _streamed_kernel_acc(x_ref, w_ref, b_ref, o_ref, acc_ref):
    k = pl.program_id(2)

    @pl.when(k == 0)
    def _():
        acc_ref[...] = jnp.zeros_like(acc_ref)

    acc_ref[...] += jnp.dot(x_ref[...], w_ref[0],
                            preferred_element_type=jnp.float32)

    @pl.when(k == pl.num_programs(2) - 1)
    def _():
        o_ref[...] = (acc_ref[...] + b_ref[...]).astype(o_ref.dtype)


# ---------------------------------------------------------------------------
# "Module init": prepare the fixed (clamped) buffers once, pick a plan.
# ---------------------------------------------------------------------------
def make_linear_clamped(weights, bias_values=None, dtype=jnp.float32, *,
                        tm_cap=256, tn_cap=256, tk_cap=1024,
                        resident_weight_bytes=4 * 1024 * 1024,
                        weight_buffer_count=2, force_streamed=False):
    """Builds forward(x) equivalent to LinearClamped(in, out, weights, bias).

    weights:     (out_features, in_features) fixed buffer.
    bias_values: (out_features,) fixed buffer or None.
    dtype:       compute dtype of activations/weights.  f32 default matches
                 torch.get_default_dtype(); bf16 gives ~4x MXU throughput on
                 v6e/v7x and halves DMA bytes (accumulation stays f32).
    """
    dtype = np.dtype(dtype)
    itemsize = dtype.itemsize
    # sublane packing: 8 rows per vreg at 32-bit, 16 at 16-bit, 32 at 8-bit.
    row_align = {4: 8, 2: 16, 1: 32}.get(itemsize, 8)

    w_np = np.asarray(weights, dtype=dtype)                 # (out, in)
    out_features, in_features = w_np.shape
    Np = _round_up(out_features, 128)                        # lane-dense output

    # Bias: padded f32 row prepared once (zeros if no bias) -> no in-kernel
    # cast and no extra kernel variant for the bias-less case.
    b_host = np.zeros((1, Np), dtype=np.float32)
    if bias_values is not None:
        b_host[0, :out_features] = np.asarray(bias_values, np.float32).reshape(-1)
    b_p = jnp.asarray(b_host)

    # Residency decision: whole (K, Np) weight in VMEM when small enough
    # (plus a cap on K so the per-M-block activation tile also stays small).
    resident = (not force_streamed
                and in_features * Np * itemsize <= resident_weight_bytes
                and in_features * itemsize <= 8192)

    if resident:
        w_host = np.zeros((in_features, Np), dtype=dtype)
        w_host[:, :out_features] = w_np.T
        w_dev = jnp.asarray(w_host)
        tk, tn, Kp, nkb = in_features, Np, in_features, 1
    else:
        # tk = full K when it fits a tile (no per-call K padding of x),
        # else a 128-aligned cap (partial K blocks must be zero padded).
        tk_cap_al = max(128, (tk_cap // 128) * 128)
        tk = in_features if in_features <= tk_cap_al else tk_cap_al
        Kp = _round_up(in_features, tk)
        tn = 128
        for cand in (1024, 512, 256):
            if cand <= tn_cap and Np % cand == 0:
                tn = cand
                break
        nkb, nnb = Kp // tk, Np // tn
        # Pre-block the fixed weight ONCE into tile-contiguous slabs so every
        # streamed DMA is one contiguous copy: shape (nnb*nkb, tk, tn).
        w_pad = np.zeros((Kp, Np), dtype=dtype)
        w_pad[:in_features, :out_features] = w_np.T
        w_dev = jnp.asarray(
            w_pad.reshape(nkb, tk, nnb, tn).transpose(2, 0, 1, 3)
                 .reshape(nnb * nkb, tk, tn))

    tm_cap_al = _round_up(max(tm_cap, row_align), row_align)

    def _pick_tm(Bp):
        tm = min(tm_cap_al, Bp)
        # Prefer >= 2 M blocks when there is enough work: the M axis is
        # "parallel", so v7x's two TensorCores each get a share.
        if tm == Bp and Bp >= 4 * row_align:
            tm = _round_up(Bp // 2, row_align)
        return tm

    def forward(x):
        x = jnp.asarray(x, dtype=dtype)
        if x.ndim == 1:                                   # torch: input.view(1, -1)
            x = x.reshape(1, -1)
        lead = x.shape[:-1]
        x2d = x.reshape(-1, in_features)
        B = x2d.shape[0]

        # Pad rows only up to the sublane alignment (< row_align extra rows,
        # and only when B is not already aligned) -> no big M over-padding.
        Bp = _round_up(B, row_align)
        if Bp != B:
            x2d = jnp.zeros((Bp, in_features), dtype=dtype).at[:B].set(x2d)

        tm = _pick_tm(Bp)
        grid_m = pl.cdiv(Bp, tm)          # partial trailing M block handled by Pallas
        out_bytes = Bp * Np * itemsize
        flops = 2 * Bp * Kp * Np
        cparams_kw = dict(vmem_limit_bytes=32 * 1024 * 1024)

        if resident:
            cost = pl.CostEstimate(
                flops=flops, transcendentals=0,
                bytes_accessed=int(Bp * in_features * itemsize
                                   + in_features * Np * itemsize
                                   + Np * 4 + out_bytes))
            y = pl.pallas_call(
                _resident_kernel,
                out_shape=jax.ShapeDtypeStruct((Bp, Np), dtype),
                grid_spec=pltpu.PrefetchScalarGridSpec(
                    num_scalar_prefetch=0,
                    grid=(grid_m,),
                    in_specs=[
                        pl.BlockSpec((tm, in_features), lambda i: (i, 0)),
                        # constant block index -> DMA'd once, VMEM-resident
                        pl.BlockSpec((in_features, Np), lambda i: (0, 0)),
                        pl.BlockSpec((1, Np), lambda i: (0, 0)),
                    ],
                    out_specs=pl.BlockSpec((tm, Np), lambda i: (i, 0))),
                compiler_params=pltpu.CompilerParams(
                    dimension_semantics=("parallel",), **cparams_kw),
                cost_estimate=cost,
            )(x2d, w_dev, b_p)
        else:
            # Zero-pad x along K only when K is split across grid steps
            # (partial K blocks would otherwise feed garbage/NaN into the
            # accumulator despite the zero-padded weight).
            if Kp != in_features:
                x_in = jnp.zeros((Bp, Kp), dtype=dtype).at[:, :in_features].set(x2d)
            else:
                x_in = x2d

            w_spec_kw = {}
            if weight_buffer_count != 2:
                # e.g. Buffered(3) on v5e to hide exposed weight DMA.
                w_spec_kw["pipeline_mode"] = pl.Buffered(weight_buffer_count)

            if dtype == jnp.float32:
                kern, scratch = _streamed_kernel_f32, []
            else:
                kern, scratch = (_streamed_kernel_acc,
                                 [pltpu.VMEM((tm, tn), jnp.float32)])

            cost = pl.CostEstimate(
                flops=flops, transcendentals=0,
                bytes_accessed=int(grid_m * Kp * Np * itemsize
                                   + (Np // tn) * Bp * Kp * itemsize
                                   + Np * 4 + out_bytes))
            y = pl.pallas_call(
                kern,
                out_shape=jax.ShapeDtypeStruct((Bp, Np), dtype),
                grid_spec=pltpu.PrefetchScalarGridSpec(
                    num_scalar_prefetch=0,
                    grid=(grid_m, Np // tn, Kp // tk),
                    in_specs=[
                        pl.BlockSpec((tm, tk), lambda i, j, k: (i, k)),
                        pl.BlockSpec((1, tk, tn),
                                     lambda i, j, k: (j * nkb + k, 0, 0),
                                     **w_spec_kw),
                        pl.BlockSpec((1, tn), lambda i, j, k: (0, j)),
                    ],
                    out_specs=pl.BlockSpec((tm, tn), lambda i, j, k: (i, j)),
                    scratch_shapes=scratch),
                compiler_params=pltpu.CompilerParams(
                    dimension_semantics=("parallel", "parallel", "arbitrary"),
                    **cparams_kw),
                cost_estimate=cost,
            )(x_in, w_dev, b_p)

        return y[:B, :out_features].reshape(*lead, out_features)

    return jax.jit(forward)


if __name__ == "__main__":
    # Small shapes consistent with LinearClamped(in_features=32, out_features=16).
    in_features, out_features, batch = 32, 16, 8

    # Deterministic fixed weights / bias (as passed to the torch __init__).
    weights = (np.arange(out_features * in_features, dtype=np.float32)
               .reshape(out_features, in_features) % 7 - 3.0) * 0.1
    bias_values = (np.arange(out_features, dtype=np.float32) - 8.0) * 0.05

    key = jax.random.PRNGKey(0)
    x = jax.random.normal(key, (batch, in_features), dtype=jnp.float32)
    x_big = jax.random.normal(jax.random.PRNGKey(1), (40, in_features),
                              dtype=jnp.float32)      # multi-M-block + partial block

    # Resident-weight path (the intended LinearClamped regime).
    lin = make_linear_clamped(weights, bias_values)
    lin_nobias = make_linear_clamped(weights, None)
    lin_bf16 = make_linear_clamped(weights, bias_values, dtype=jnp.bfloat16)
    # Streamed fallback path (forced, to exercise both streamed kernels).
    lin_stream = make_linear_clamped(weights, bias_values, force_streamed=True)
    lin_stream_bf16 = make_linear_clamped(weights, bias_values,
                                          dtype=jnp.bfloat16, force_streamed=True)

    W = jnp.asarray(weights)
    b = jnp.asarray(bias_values)
    ref = x @ W.T + b
    ref_big = x_big @ W.T + b
    ref_nb = x @ W.T

    y = jax.block_until_ready(lin(x))                 # 2-D input
    y1 = jax.block_until_ready(lin(x[0]))             # 1-D input -> (1, out)
    ybig = jax.block_until_ready(lin(x_big))          # weight reused across M blocks
    ynb = jax.block_until_ready(lin_nobias(x))        # no-bias path
    ybf = jax.block_until_ready(lin_bf16(x))          # bf16 compute, f32 accum
    ys = jax.block_until_ready(lin_stream(x))         # streamed, f32 direct accum
    ysbf = jax.block_until_ready(lin_stream_bf16(x))  # streamed, f32 scratch

    assert y.shape == (batch, out_features)
    assert y1.shape == (1, out_features)
    assert ybig.shape == (40, out_features)
    assert ynb.shape == (batch, out_features)
    np.testing.assert_allclose(np.asarray(y), np.asarray(ref), rtol=1e-5, atol=1e-5)
    np.testing.assert_allclose(np.asarray(y1), np.asarray(ref[:1]), rtol=1e-5, atol=1e-5)
    np.testing.assert_allclose(np.asarray(ybig), np.asarray(ref_big), rtol=1e-5, atol=1e-5)
    np.testing.assert_allclose(np.asarray(ynb), np.asarray(ref_nb), rtol=1e-5, atol=1e-5)
    np.testing.assert_allclose(np.asarray(ys), np.asarray(ref), rtol=1e-5, atol=1e-5)
    np.testing.assert_allclose(np.asarray(ybf).astype(np.float32), np.asarray(ref),
                               rtol=3e-2, atol=3e-2)
    np.testing.assert_allclose(np.asarray(ysbf).astype(np.float32), np.asarray(ref),
                               rtol=3e-2, atol=3e-2)

    print("KERNEL_OK")
</pallas_src>

<mosaic_0001>
module attributes {stable_mosaic.version = 11 : i64} {
  func.func @_resident_kernel(%arg0: i32, %arg1: memref<8x32xf32, #tpu.memory_space<vmem>>, %arg2: memref<32x128xf32, #tpu.memory_space<vmem>>, %arg3: memref<1x128xf32, #tpu.memory_space<vmem>>, %arg4: memref<8x128xf32, #tpu.memory_space<vmem>>) attributes {dimension_semantics = [#tpu.dimension_semantics<parallel>], iteration_bounds = array<i64: 1>, scalar_prefetch = 0 : i64, scratch_operands = 0 : i64, tpu.core_type = #tpu.core_type<tc>, window_params = [{transform_indices = @transform_0, window_bounds = array<i64: 8, 32>}, {pipeline_mode = #tpu.pipeline_mode<synchronous>, transform_indices = @transform_1, window_bounds = array<i64: 32, 128>}, {pipeline_mode = #tpu.pipeline_mode<synchronous>, transform_indices = @transform_2, window_bounds = array<i64: 1, 128>}, {transform_indices = @transform_3, window_bounds = array<i64: 8, 128>}]} {
    %c0 = arith.constant 0 : index
    %c0_0 = arith.constant 0 : index
    %0 = vector.load %arg1[%c0, %c0_0] : memref<8x32xf32, #tpu.memory_space<vmem>>, vector<8x32xf32>
    %c0_1 = arith.constant 0 : index
    %c0_2 = arith.constant 0 : index
    %1 = vector.load %arg2[%c0_1, %c0_2] : memref<32x128xf32, #tpu.memory_space<vmem>>, vector<32x128xf32>
    %cst = arith.constant dense<0.000000e+00> : vector<8x128xf32>
    %2 = tpu.matmul %0, %1, %cst {dimension_numbers = #tpu.dot_dimension_numbers<[1], [0], [0], [1], [0, 0, 1, 1], [], []>} : vector<8x32xf32>, vector<32x128xf32>, vector<8x128xf32> -> vector<8x128xf32>
    %c0_3 = arith.constant 0 : index
    %c0_4 = arith.constant 0 : index
    %3 = vector.load %arg3[%c0_3, %c0_4] : memref<1x128xf32, #tpu.memory_space<vmem>>, vector<1x128xf32>
    %4 = vector.broadcast %3 : vector<1x128xf32> to vector<8x128xf32>
    %5 = arith.addf %2, %4 : vector<8x128xf32>
    %c0_5 = arith.constant 0 : index
    %c0_6 = arith.constant 0 : index
    %6 = vector.load %arg4[%c0_5, %c0_6] : memref<8x128xf32, #tpu.memory_space<vmem>>, vector<8x128xf32>
    tpu.vector_store %arg4[%c0_5, %c0_6], %5 {strides = array<i32>} : memref<8x128xf32, #tpu.memory_space<vmem>>, vector<8x128xf32>,
    return
  }
  func.func @transform_0(%arg0: i32) -> (i32, i32) {
    %c0_i32 = arith.constant 0 : i32
    %c0_i32_0 = arith.constant 0 : i32
    return %arg0, %c0_i32 : i32, i32
  }
  func.func @transform_1(%arg0: i32) -> (i32, i32) {
    %c0_i32 = arith.constant 0 : i32
    %c0_i32_0 = arith.constant 0 : i32
    %c0_i32_1 = arith.constant 0 : i32
    return %c0_i32, %c0_i32_0 : i32, i32
  }
  func.func @transform_2(%arg0: i32) -> (i32, i32) {
    %c0_i32 = arith.constant 0 : i32
    %c0_i32_0 = arith.constant 0 : i32
    %c0_i32_1 = arith.constant 0 : i32
    return %c0_i32, %c0_i32_0 : i32, i32
  }
  func.func @transform_3(%arg0: i32) -> (i32, i32) {
    %c0_i32 = arith.constant 0 : i32
    %c0_i32_0 = arith.constant 0 : i32
    return %arg0, %c0_i32 : i32, i32
  }
}

</mosaic_0001>

<bundles_post_ra>
// kernel: forward.1
= control target key start
LH: loop header
LB: loop body
LE: loop exit
PB: predicated region body
PF: predicated region fallthrough
CT: control target
= control target key end

     0   :  { %8 = vsyncpa [#allocation3], 0  ;;  %s219_s0 = inlined_call_operand.hbm [shape: f32[8,32], index: 0, kind: input, shape index: {}]   ;;  %s220_s1 = inlined_call_operand.hbm [shape: f32[32,128], index: 1, kind: input, shape index: {}]   ;;  %s221_s2 = inlined_call_operand.vmem [shape: f32[1,128], index: 2, kind: input, shape index: {}]   ;;  %s222_s3 = inlined_call_operand.hbm [shape: f32[8,128], index: 3, kind: output, shape index: {}]  }
   0x1   :  { %9 = vsyncpa [#allocation6], 0 }
   0x2   :  { %10 = vsyncpa [#allocation4], 0  ;;  %s16_s14 = sshll.u32 %s219_s0, 4  ;;  %s182_s15 = smov [#allocation2]   ;;  %s17_s14 = int_to_ptr.hbm [resolvable:$true] %s16_s14 }
   0x3   :  { %s18_s16 = sshll.u32 %s182_s15, 4  ;;  %s26_s19 = sshll.u32 %s220_s1, 4  ;;  %s19_s16 = int_to_ptr.vmem [resolvable:$true] %s18_s16  ;;  %s27_s19 = int_to_ptr.hbm [resolvable:$true] %s26_s19 }
   0x4   :  { %21 = dma.hbm_to_vmem [thread:$0]  %s17_s14, 128, %s19_s16, [#allocation3]  }
   0x5   :  { %s183_s20 = smov [#allocation5]   ;;  %s184_s22 = smov 128  }
   0x6   :  { %s28_s21 = sshll.u32 %s183_s20, 4  ;;  %s185_s23 = smov 8   ;;  %s29_s21 = int_to_ptr.vmem [resolvable:$true] %s28_s21 }
   0x7   :  { %34 = dma.hbm_to_vmem [thread:$0]  %s27_s19, 512, %s29_s21, [#allocation6], %s184_s22, %s184_s22, %s185_s23  }
   0x8   :  { %176 = dma.done.wait [#allocation3], 128  }
   0x9   :  { %177 = vsyncadd [#allocation3], 4294967168 }
   0xa   :  { %178 = dma.done.wait [#allocation6], 512  }
   0xb   :  { %179 = vsyncadd [#allocation6], 4294966784  ;;  %v49_v0 = vld [vmem:[#allocation5 + $0x18] sm:$0xff]  ;;  %v48_v1 = vld [vmem:[#allocation5 + $0x10] sm:$0xff]  ;;  %vm54_vm0 = vcmask 261120   ;;  %s186_s24 = smov [#allocation7]  }
   0xc   :  { %70 = vmatpush.msra.mxu0 %v49_v0  ;;  %v47_v2 = vld [vmem:[#allocation5 + $0x8] sm:$0xff]  ;;  %v46_v3 = vld [vmem:[#allocation5] sm:$0xff]  ;;  %v45_v4 = vld [vmem:[#allocation2] sm:$0xff]  ;;  %s84_s25 = sshll.u32 %s186_s24, 4  ;;  %s86_s28 = sshll.u32 %s222_s3, 4  ;;  %s85_s25 = int_to_ptr.vmem [resolvable:$true] %s84_s25  ;;  %s87_s28 = int_to_ptr.hbm [resolvable:$true] %s86_s28 }
   0xd   :  { %v103_v5 = vld [vmem:[%s221_s2] ss:$0 sm:$0xff] }
   0xe   :  { %71 = vmatpush.msra.mxu0 %v48_v1 }
  0x10   :  { %72 = vmatpush.msra.mxu0 %v47_v2 }
  0x12   :  { %73 = vmatpush.msra.mxu0 %v46_v3 }
  0x13   :  { %97 = vmatmul.msk.f32.vlgmr.msra.gmra.mxu0 %vm54_vm0, %v45_v4 }
  0x90   :  { %v75_v6 = vpop.f32.mrf.mxu0 }
  0x91   :  { %v76_v7 = vadd.f32 %v103_v5, %v75_v6 }
  0x93   :  { %78 = vst [vmem:[#allocation7] sm:$0xff] %v76_v7 }
  0x94   :  { %89 = dma.vmem_to_hbm [thread:$0]  %s85_s25, 128, %s87_s28, [#allocation4]  }
  0x95   :  { %180 = dma.done.wait [#allocation4], 128  }
  0x96   :  { %181 = vsyncadd [#allocation4], 4294967168 }
  0x97   :  { %94 = vsyncpa [#allocation3], 1 }
  0x98   :  { %95 = vsyncpa [#allocation6], 1 }
  0x99   :  { %96 = vsyncpa [#allocation4], 1 }

</bundles_post_ra>
